<compile_context>
chip_gen: v6e
topology: v6e:2x2x1
jax: 0.10.0
libtpu: 0.0.40
codegen_flags: <defaults>
</compile_context>

<pallas_src>
from functools import partial

import numpy as np
import jax
import jax.numpy as jnp
from jax import lax
from jax.experimental import pallas as pl
from jax.experimental.pallas import tpu as pltpu

# Default FSRS weights (17 parameters) -- deterministic init, no checkpoint.
DEFAULT_W = [
    0.4872, 1.4003, 3.7145, 13.8206,   # w0..w3 : initial stability per rating
    5.1618, 1.2298, 0.8975, 0.031,     # w4..w7 : difficulty params
    1.6474, 0.1367, 1.0461,            # w8..w10: stability-after-success
    2.1072, 0.0793, 0.3246, 1.587,     # w11..w14: stability-after-failure
    0.2272, 2.8755,                    # w15, w16: hard penalty / easy bonus
]

B_SUB, B_LANE = 8, 128                  # one batch tile = full (8,128) vreg
B_TILE = B_SUB * B_LANE                 # 1024 batch elements per tile


def _fsrs_kernel(c_ref, init_ref, x_ref, state0_ref, out_ref, state_ref):
    # c_ref:      SMEM (18,) f32 -- precomputed constants (see _pack_constants)
    # init_ref:   SMEM (1,)  i32 -- 1 iff the (unpadded) initial state is all-zero
    # x_ref:      VMEM (T_CHUNK, 2, 8, 128) f32 -- planes: [elapsed; rating]
    # state0_ref: VMEM (2, 8, 128) f32 -- user-supplied initial [s; d]
    # out_ref:    VMEM (T_CHUNK, 2, 8, 128) f32 -- per-step [s; d]
    # state_ref:  VMEM (2, 8, 128) f32 -- state carried across seq chunks
    chunk = pl.program_id(1)
    t_chunk = x_ref.shape[0]
    vshape = (x_ref.shape[2], x_ref.shape[3])

    # --- loop-invariant constants: read SMEM scalars once, splat to full
    # (8,128) vregs BEFORE the hot loop (broadcast_in_dim is not CSE'd). ---
    def splat(v):
        return jnp.full(vshape, v, dtype=jnp.float32)

    w6_v = splat(c_ref[6])
    mr_a_v, mr_b_v = splat(c_ref[7]), splat(c_ref[8])       # w7*w4, (1-w7)
    exp_w8_v = splat(c_ref[9])
    om_w9_v = splat(c_ref[10])                              # 1 - w9
    w10_v = splat(c_ref[11])
    w11_v = splat(c_ref[12])
    neg_w12_v = splat(c_ref[13])
    w13_v, w14_v = splat(c_ref[14]), splat(c_ref[15])
    w15_v, w16_v = splat(c_ref[16]), splat(c_ref[17])
    one_v = jnp.ones(vshape, jnp.float32)

    def fast_div(num, den):
        # num / den via EUP approximate reciprocal + 2 Newton-Raphson steps
        # (VALU-only refinement; keeps the f32 divide sequence off the VALU
        # and gives ~f32 accuracy so the recurrence doesn't drift).
        inv = pl.reciprocal(den, approx=True)
        inv = inv * (2.0 - den * inv)
        inv = inv * (2.0 - den * inv)
        return num * inv

    def recurrence(elapsed, rating, s, d):
        # power_forgetting_curve(t, s) = (1 + t/(9s))^-1 = 9s / (9s + t)
        nine_s = 9.0 * s
        r = fast_div(nine_s, nine_s + elapsed)
        one_m_r = one_v - r
        new_d = d - w6_v * (rating - 3.0)
        new_d = mr_a_v + mr_b_v * new_d                      # mean_reversion(w4, .)
        new_d = jnp.clip(new_d, 1.0, 10.0)
        # hard penalty / easy bonus: rating can't be both 2 and 4 -> one select
        he = jnp.where(rating == 2.0, w15_v,
                       jnp.where(rating == 4.0, w16_v, one_v))
        # success: s*(1 + e^w8*(11-d')*s^-w9*(e^((1-r)w10)-1)*he)
        #        = s + e^w8*(11-d')*s^(1-w9)*(e^((1-r)w10)-1)*he
        s_pow = jnp.exp(om_w9_v * jnp.log(s))                # s^(1-w9)
        s_succ = s + (exp_w8_v * (11.0 - new_d)) * s_pow \
                   * (jnp.exp(one_m_r * w10_v) - 1.0) * he
        # failure: w11 * d'^-w12 * ((s+1)^w13 - 1) * e^((1-r)w14)
        #   (pow*exp fused into a single exp -> one fewer EUP issue)
        fail_e = jnp.exp(neg_w12_v * jnp.log(new_d) + one_m_r * w14_v)
        fail_p = jnp.exp(w13_v * jnp.log(s + 1.0)) - 1.0
        s_fail = w11_v * fail_e * fail_p
        new_s = jnp.where(rating > 1.0, s_succ, s_fail)
        new_s = jnp.clip(new_s, 0.1, 36500.0)
        return new_s, new_d

    @pl.when(chunk == 0)
    def _():
        # First timestep of the sequence: the only place the
        # torch.equal(state, zeros) init branch can apply (stability is
        # clipped to >= 0.1 on every later step).
        w0, w1, w2, w3 = c_ref[0], c_ref[1], c_ref[2], c_ref[3]
        w4, w5 = c_ref[4], c_ref[5]
        s = state0_ref[0]
        d = state0_ref[1]
        elapsed = x_ref[0, 0]
        rating = x_ref[0, 1]
        use_init = init_ref[0] != 0                          # torch.equal semantics
        # When the init branch fires the recurrence result is discarded; feed
        # it s=1 so log(0)/div-by-0 never produce inf/nan that a future
        # rewrite could let leak through the select.
        s_rec = jnp.where(use_init, one_v, s)
        rec_s, rec_d = recurrence(elapsed, rating, s_rec, d)
        # Init branch: new_s = w[rating-1] for rating in {1..4}, else 1.
        init_s = jnp.where(rating == 1.0, w0,
                 jnp.where(rating == 2.0, w1,
                 jnp.where(rating == 3.0, w2,
                 jnp.where(rating == 4.0, w3, 1.0))))
        init_s = jnp.clip(init_s, 0.1, 36500.0)
        init_d = jnp.clip(w4 - w5 * (rating - 3.0), 1.0, 10.0)
        new_s = jnp.where(use_init, init_s, rec_s)
        new_d = jnp.where(use_init, init_d, rec_d)
        out_ref[0, 0] = new_s
        out_ref[0, 1] = new_d
        state_ref[0] = new_s
        state_ref[1] = new_d

    # --- steady-state recurrence, traced ONCE; chunk 0 starts at step 1. ---
    def body(i, carry):
        s, d = carry
        new_s, new_d = recurrence(x_ref[i, 0], x_ref[i, 1], s, d)
        out_ref[i, 0] = new_s                                # full-vreg stores
        out_ref[i, 1] = new_d
        return new_s, new_d

    start = jnp.where(chunk == 0, 1, 0)
    s_fin, d_fin = lax.fori_loop(start, t_chunk, body,
                                 (state_ref[0], state_ref[1]))
    state_ref[0] = s_fin
    state_ref[1] = d_fin


def _pack_constants(w):
    """Fold loop-invariant weight expressions once, outside the kernel."""
    w = w.astype(jnp.float32)
    return jnp.stack([
        w[0], w[1], w[2], w[3],            # 0..3  initial stability per rating
        w[4], w[5], w[6],                  # 4..6
        w[7] * w[4], 1.0 - w[7],           # 7, 8  mean-reversion constants
        jnp.exp(w[8]), 1.0 - w[9], w[10],  # 9..11 success-branch constants
        w[11], -w[12], w[13], w[14],       # 12..15 failure-branch constants
        w[15], w[16],                      # 16, 17 hard penalty / easy bonus
    ])


@partial(jax.jit, static_argnames=("t_chunk",))
def fsrs_forward(inputs, w, state=None, *, t_chunk=256):
    """FSRS forward pass.

    inputs: (seq_len, batch, 2) f32; [:, :, 0] elapsed days, [:, :, 1] rating.
    w:      (17,) f32 FSRS weights.
    state:  optional (batch, 2) f32 initial [stability, difficulty].
    Returns (outputs (seq_len, batch, 2), final_state (batch, 2)).
    """
    seq_len, batch, nfeat = inputs.shape
    assert nfeat == 2
    if state is None:
        state = jnp.zeros((batch, 2), jnp.float32)

    # ---- static tiling.  Per grid step the in+out blocks are
    # 2 * t_chunk * 8 KiB; double-buffered = 4 * t_chunk * 8 KiB.  The default
    # t_chunk=256 (~8 MiB) fits every generation's default scoped VMEM
    # (v5e 16 MiB / v6e+v7x 32 MiB) without touching vmem_limit_bytes.
    t_chunk = max(1, min(t_chunk, seq_len))
    n_chunks = pl.cdiv(seq_len, t_chunk)
    seq_pad = n_chunks * t_chunk
    n_btiles = pl.cdiv(batch, B_TILE)       # batch tile = 8 sublanes x 128 lanes
    b_pad = n_btiles * B_TILE
    pad_t, pad_b = seq_pad - seq_len, b_pad - batch

    # ---- full-vreg layout: (seq, 2, n_btiles*8, 128); pad lanes/steps with
    # benign values (padded lanes/steps are sliced off on output).
    elapsed = jnp.pad(inputs[:, :, 0].astype(jnp.float32),
                      ((0, pad_t), (0, pad_b)), constant_values=1.0)
    rating = jnp.pad(inputs[:, :, 1].astype(jnp.float32),
                     ((0, pad_t), (0, pad_b)), constant_values=3.0)
    elapsed = elapsed.reshape(seq_pad, n_btiles * B_SUB, B_LANE)
    rating = rating.reshape(seq_pad, n_btiles * B_SUB, B_LANE)
    x = jnp.stack([elapsed, rating], axis=1)        # (seq_pad, 2, nb*8, 128)

    s0 = jnp.pad(state[:, 0].astype(jnp.float32), (0, pad_b), constant_values=1.0)
    d0 = jnp.pad(state[:, 1].astype(jnp.float32), (0, pad_b), constant_values=5.0)
    state_p = jnp.stack([s0.reshape(n_btiles * B_SUB, B_LANE),
                         d0.reshape(n_btiles * B_SUB, B_LANE)], axis=0)

    # torch.equal(state, zeros) semantics: one global flag over the *unpadded*
    # initial state, evaluated once (the state can never return to all-zero).
    init_flag = jnp.all(state == 0.0).astype(jnp.int32).reshape(1)

    consts = _pack_constants(jnp.asarray(w, jnp.float32))

    out = pl.pallas_call(
        _fsrs_kernel,
        grid=(n_btiles, n_chunks),
        in_specs=[
            pl.BlockSpec(memory_space=pltpu.MemorySpace.SMEM),             # consts (18,)
            pl.BlockSpec(memory_space=pltpu.MemorySpace.SMEM),             # init flag (1,)
            pl.BlockSpec((t_chunk, 2, B_SUB, B_LANE),
                         lambda b, c: (c, 0, b, 0)),                       # inputs
            pl.BlockSpec((2, B_SUB, B_LANE), lambda b, c: (0, b, 0)),      # initial state
        ],
        out_specs=pl.BlockSpec((t_chunk, 2, B_SUB, B_LANE),
                               lambda b, c: (c, 0, b, 0)),
        out_shape=jax.ShapeDtypeStruct((seq_pad, 2, n_btiles * B_SUB, B_LANE),
                                       jnp.float32),
        scratch_shapes=[pltpu.VMEM((2, B_SUB, B_LANE), jnp.float32)],      # chunk-carry state
        compiler_params=pltpu.CompilerParams(
            dimension_semantics=("parallel", "arbitrary")),  # batch tiles || ; seq serial
    )(consts, init_flag, x, state_p)

    out = out[:seq_len].reshape(seq_len, 2, b_pad)[:, :, :batch]
    outputs = jnp.transpose(out, (0, 2, 1))                  # (seq, batch, 2)
    return outputs, outputs[-1]


# ---------------- pure-numpy reference (mirrors the PyTorch module) ----------------
def _ref_forward(inputs, w, state=None):
    inputs = np.asarray(inputs, np.float32)
    w = np.asarray(w, np.float32)
    seq_len, batch, _ = inputs.shape
    if state is None:
        state = np.zeros((batch, 2), np.float32)
    else:
        state = np.asarray(state, np.float32).copy()
    outs = []
    for t in range(seq_len):
        X = inputs[t]
        if np.array_equal(state, np.zeros_like(state)):
            rating = X[:, 1]
            new_s = np.ones(batch, np.float32)
            for k in range(4):
                new_s = np.where(rating == k + 1, w[k], new_s)
            new_d = np.clip(w[4] - w[5] * (rating - 3.0), 1.0, 10.0)
        else:
            r = 1.0 / (1.0 + X[:, 0] / (9.0 * state[:, 0]))
            new_d = state[:, 1] - w[6] * (X[:, 1] - 3.0)
            new_d = w[7] * w[4] + (1.0 - w[7]) * new_d
            new_d = np.clip(new_d, 1.0, 10.0)
            hard = np.where(X[:, 1] == 2.0, w[15], 1.0)
            easy = np.where(X[:, 1] == 4.0, w[16], 1.0)
            s_succ = state[:, 0] * (1.0 + np.exp(w[8]) * (11.0 - new_d)
                                    * np.power(state[:, 0], -w[9])
                                    * (np.exp((1.0 - r) * w[10]) - 1.0) * hard * easy)
            s_fail = (w[11] * np.power(new_d, -w[12])
                      * (np.power(state[:, 0] + 1.0, w[13]) - 1.0)
                      * np.exp((1.0 - r) * w[14]))
            new_s = np.where(X[:, 1] > 1.0, s_succ, s_fail)
        new_s = np.clip(new_s, 0.1, 36500.0)
        state = np.stack([new_s, new_d], axis=1).astype(np.float32)
        outs.append(state)
    return np.stack(outs), state


if __name__ == "__main__":
    w = jnp.asarray(DEFAULT_W, dtype=jnp.float32)
    # Tolerance: TPU EUP exp/log/reciprocal differ slightly from numpy and the
    # differences compound through the sequential recurrence.
    RTOL, ATOL = 2e-2, 1e-2

    # --- test 1: zero initial state (module default), single seq chunk ---
    seq_len, batch = 8, 8
    key = jax.random.PRNGKey(0)
    k1, k2, k3 = jax.random.split(key, 3)
    elapsed = jax.random.randint(k1, (seq_len, batch), 0, 30).astype(jnp.float32)
    rating = jax.random.randint(k2, (seq_len, batch), 1, 5).astype(jnp.float32)
    inputs = jnp.stack([elapsed, rating], axis=-1)            # (seq_len, batch, 2)

    outputs, final_state = fsrs_forward(inputs, w)
    jax.block_until_ready((outputs, final_state))
    ref_out, ref_state = _ref_forward(np.asarray(inputs), np.asarray(w))
    np.testing.assert_allclose(np.asarray(outputs), ref_out, rtol=RTOL, atol=ATOL)
    np.testing.assert_allclose(np.asarray(final_state), ref_state, rtol=RTOL, atol=ATOL)

    # --- test 2: non-zero initial state + multiple seq chunks (state carry) ---
    seq_len2, batch2 = 16, 8
    k4, k5, k6 = jax.random.split(k3, 3)
    elapsed2 = jax.random.randint(k4, (seq_len2, batch2), 0, 30).astype(jnp.float32)
    rating2 = jax.random.randint(k5, (seq_len2, batch2), 1, 5).astype(jnp.float32)
    inputs2 = jnp.stack([elapsed2, rating2], axis=-1)
    state2 = jnp.stack([
        jax.random.uniform(k6, (batch2,), minval=0.5, maxval=20.0),   # stability
        jax.random.uniform(k6, (batch2,), minval=1.0, maxval=10.0),   # difficulty
    ], axis=-1).astype(jnp.float32)

    outputs2, final2 = fsrs_forward(inputs2, w, state2, t_chunk=4)
    jax.block_until_ready((outputs2, final2))
    ref_out2, ref_state2 = _ref_forward(np.asarray(inputs2), np.asarray(w),
                                        np.asarray(state2))
    np.testing.assert_allclose(np.asarray(outputs2), ref_out2, rtol=RTOL, atol=ATOL)
    np.testing.assert_allclose(np.asarray(final2), ref_state2, rtol=RTOL, atol=ATOL)

    print("KERNEL_OK")
</pallas_src>

<mosaic_0001>
module attributes {stable_mosaic.version = 11 : i64} {
  func.func @_fsrs_kernel(%arg0: i32, %arg1: i32, %arg2: memref<18xf32, #tpu.memory_space<smem>>, %arg3: memref<1xi32, #tpu.memory_space<smem>>, %arg4: memref<8x2x8x128xf32, #tpu.memory_space<vmem>>, %arg5: memref<2x8x128xf32, #tpu.memory_space<vmem>>, %arg6: memref<8x2x8x128xf32, #tpu.memory_space<vmem>>, %arg7: memref<2x8x128xf32, #tpu.memory_space<vmem>>) attributes {dimension_semantics = [#tpu.dimension_semantics<parallel>, #tpu.dimension_semantics<arbitrary>], iteration_bounds = array<i64: 1, 1>, scalar_prefetch = 0 : i64, scratch_operands = 1 : i64, tpu.core_type = #tpu.core_type<tc>, window_params = [{transform_indices = @transform_0, window_bounds = array<i64: 18>}, {transform_indices = @transform_1, window_bounds = array<i64: 1>}, {transform_indices = @transform_2, window_bounds = array<i64: 8, 2, 8, 128>}, {transform_indices = @transform_3, window_bounds = array<i64: 2, 8, 128>}, {transform_indices = @transform_4, window_bounds = array<i64: 8, 2, 8, 128>}]} {
    %c6 = arith.constant 6 : index
    %0 = memref.load %arg2[%c6] : memref<18xf32, #tpu.memory_space<smem>>
    %1 = vector.broadcast %0 : f32 to vector<8x128xf32>
    %c7 = arith.constant 7 : index
    %2 = memref.load %arg2[%c7] : memref<18xf32, #tpu.memory_space<smem>>
    %3 = vector.broadcast %2 : f32 to vector<8x128xf32>
    %c8 = arith.constant 8 : index
    %4 = memref.load %arg2[%c8] : memref<18xf32, #tpu.memory_space<smem>>
    %5 = vector.broadcast %4 : f32 to vector<8x128xf32>
    %c9 = arith.constant 9 : index
    %6 = memref.load %arg2[%c9] : memref<18xf32, #tpu.memory_space<smem>>
    %7 = vector.broadcast %6 : f32 to vector<8x128xf32>
    %c10 = arith.constant 10 : index
    %8 = memref.load %arg2[%c10] : memref<18xf32, #tpu.memory_space<smem>>
    %9 = vector.broadcast %8 : f32 to vector<8x128xf32>
    %c11 = arith.constant 11 : index
    %10 = memref.load %arg2[%c11] : memref<18xf32, #tpu.memory_space<smem>>
    %11 = vector.broadcast %10 : f32 to vector<8x128xf32>
    %c12 = arith.constant 12 : index
    %12 = memref.load %arg2[%c12] : memref<18xf32, #tpu.memory_space<smem>>
    %13 = vector.broadcast %12 : f32 to vector<8x128xf32>
    %c13 = arith.constant 13 : index
    %14 = memref.load %arg2[%c13] : memref<18xf32, #tpu.memory_space<smem>>
    %15 = vector.broadcast %14 : f32 to vector<8x128xf32>
    %c14 = arith.constant 14 : index
    %16 = memref.load %arg2[%c14] : memref<18xf32, #tpu.memory_space<smem>>
    %17 = vector.broadcast %16 : f32 to vector<8x128xf32>
    %c15 = arith.constant 15 : index
    %18 = memref.load %arg2[%c15] : memref<18xf32, #tpu.memory_space<smem>>
    %19 = vector.broadcast %18 : f32 to vector<8x128xf32>
    %c16 = arith.constant 16 : index
    %20 = memref.load %arg2[%c16] : memref<18xf32, #tpu.memory_space<smem>>
    %21 = vector.broadcast %20 : f32 to vector<8x128xf32>
    %c17 = arith.constant 17 : index
    %22 = memref.load %arg2[%c17] : memref<18xf32, #tpu.memory_space<smem>>
    %23 = vector.broadcast %22 : f32 to vector<8x128xf32>
    %cst = arith.constant 1.000000e+00 : f32
    %24 = vector.broadcast %cst : f32 to vector<8x128xf32>
    %c0_i32 = arith.constant 0 : i32
    %25 = arith.cmpi eq, %arg1, %c0_i32 : i32
    %26 = arith.extui %25 : i1 to i32
    %c0_i32_0 = arith.constant 0 : i32
    %27 = arith.cmpi ne, %26, %c0_i32_0 : i32
    scf.if %27 {
      %c0_14 = arith.constant 0 : index
      %43 = memref.load %arg2[%c0_14] : memref<18xf32, #tpu.memory_space<smem>>
      %c1_15 = arith.constant 1 : index
      %44 = memref.load %arg2[%c1_15] : memref<18xf32, #tpu.memory_space<smem>>
      %c2 = arith.constant 2 : index
      %45 = memref.load %arg2[%c2] : memref<18xf32, #tpu.memory_space<smem>>
      %c3 = arith.constant 3 : index
      %46 = memref.load %arg2[%c3] : memref<18xf32, #tpu.memory_space<smem>>
      %c4 = arith.constant 4 : index
      %47 = memref.load %arg2[%c4] : memref<18xf32, #tpu.memory_space<smem>>
      %c5 = arith.constant 5 : index
      %48 = memref.load %arg2[%c5] : memref<18xf32, #tpu.memory_space<smem>>
      %c0_16 = arith.constant 0 : index
      %c0_17 = arith.constant 0 : index
      %c0_18 = arith.constant 0 : index
      %49 = vector.load %arg5[%c0_16, %c0_17, %c0_18] : memref<2x8x128xf32, #tpu.memory_space<vmem>>, vector<1x8x128xf32>
      %50 = vector.shape_cast %49 : vector<1x8x128xf32> to vector<8x128xf32>
      %c1_19 = arith.constant 1 : index
      %c0_20 = arith.constant 0 : index
      %c0_21 = arith.constant 0 : index
      %51 = vector.load %arg5[%c1_19, %c0_20, %c0_21] : memref<2x8x128xf32, #tpu.memory_space<vmem>>, vector<1x8x128xf32>
      %52 = vector.shape_cast %51 : vector<1x8x128xf32> to vector<8x128xf32>
      %c0_22 = arith.constant 0 : index
      %c0_23 = arith.constant 0 : index
      %c0_24 = arith.constant 0 : index
      %c0_25 = arith.constant 0 : index
      %53 = vector.load %arg4[%c0_22, %c0_23, %c0_24, %c0_25] : memref<8x2x8x128xf32, #tpu.memory_space<vmem>>, vector<1x1x8x128xf32>
      %54 = vector.shape_cast %53 : vector<1x1x8x128xf32> to vector<8x128xf32>
      %c0_26 = arith.constant 0 : index
      %c1_27 = arith.constant 1 : index
      %c0_28 = arith.constant 0 : index
      %c0_29 = arith.constant 0 : index
      %55 = vector.load %arg4[%c0_26, %c1_27, %c0_28, %c0_29] : memref<8x2x8x128xf32, #tpu.memory_space<vmem>>, vector<1x1x8x128xf32>
      %56 = vector.shape_cast %55 : vector<1x1x8x128xf32> to vector<8x128xf32>
      %c0_30 = arith.constant 0 : index
      %57 = memref.load %arg3[%c0_30] : memref<1xi32, #tpu.memory_space<smem>>
      %c0_i32_31 = arith.constant 0 : i32
      %58 = arith.cmpi ne, %57, %c0_i32_31 : i32
      %59 = arith.select %58, %24, %50 : vector<8x128xf32>
      %cst_32 = arith.constant 9.000000e+00 : f32
      %60 = vector.broadcast %cst_32 : f32 to vector<8x128xf32>
      %61 = arith.mulf %60, %59 : vector<8x128xf32>
      %62 = arith.addf %61, %54 : vector<8x128xf32>
      %63 = tpu.reciprocal %62 {approx = true} : vector<8x128xf32> -> vector<8x128xf32>
      %64 = arith.mulf %62, %63 : vector<8x128xf32>
      %cst_33 = arith.constant 2.000000e+00 : f32
      %65 = vector.broadcast %cst_33 : f32 to vector<8x128xf32>
      %66 = arith.subf %65, %64 : vector<8x128xf32>
      %67 = arith.mulf %63, %66 : vector<8x128xf32>
      %68 = arith.mulf %62, %67 : vector<8x128xf32>
      %cst_34 = arith.constant 2.000000e+00 : f32
      %69 = vector.broadcast %cst_34 : f32 to vector<8x128xf32>
      %70 = arith.subf %69, %68 : vector<8x128xf32>
      %71 = arith.mulf %67, %70 : vector<8x128xf32>
      %72 = arith.mulf %61, %71 : vector<8x128xf32>
      %73 = arith.subf %24, %72 : vector<8x128xf32>
      %cst_35 = arith.constant 3.000000e+00 : f32
      %74 = vector.broadcast %cst_35 : f32 to vector<8x128xf32>
      %75 = arith.subf %56, %74 : vector<8x128xf32>
      %76 = arith.mulf %1, %75 : vector<8x128xf32>
      %77 = arith.subf %52, %76 : vector<8x128xf32>
      %78 = arith.mulf %5, %77 : vector<8x128xf32>
      %79 = arith.addf %3, %78 : vector<8x128xf32>
      %cst_36 = arith.constant 1.000000e+00 : f32
      %cst_37 = arith.constant 1.000000e+01 : f32
      %80 = vector.broadcast %cst_36 : f32 to vector<8x128xf32>
      %81 = arith.maximumf %80, %79 : vector<8x128xf32>
      %82 = vector.broadcast %cst_37 : f32 to vector<8x128xf32>
      %83 = arith.minimumf %82, %81 : vector<8x128xf32>
      %cst_38 = arith.constant 2.000000e+00 : f32
      %84 = vector.broadcast %cst_38 : f32 to vector<8x128xf32>
      %85 = arith.cmpf oeq, %56, %84 : vector<8x128xf32>
      %cst_39 = arith.constant 4.000000e+00 : f32
      %86 = vector.broadcast %cst_39 : f32 to vector<8x128xf32>
      %87 = arith.cmpf oeq, %56, %86 : vector<8x128xf32>
      %88 = arith.select %87, %23, %24 : vector<8x128xi1>, vector<8x128xf32>
      %89 = arith.select %85, %21, %88 : vector<8x128xi1>, vector<8x128xf32>
      %90 = math.log %59 : vector<8x128xf32>
      %91 = arith.mulf %9, %90 : vector<8x128xf32>
      %92 = math.exp %91 : vector<8x128xf32>
      %cst_40 = arith.constant 1.100000e+01 : f32
      %93 = vector.broadcast %cst_40 : f32 to vector<8x128xf32>
      %94 = arith.subf %93, %83 : vector<8x128xf32>
      %95 = arith.mulf %7, %94 : vector<8x128xf32>
      %96 = arith.mulf %95, %92 : vector<8x128xf32>
      %97 = arith.mulf %73, %11 : vector<8x128xf32>
      %98 = math.exp %97 : vector<8x128xf32>
      %cst_41 = arith.constant 1.000000e+00 : f32
      %99 = vector.broadcast %cst_41 : f32 to vector<8x128xf32>
      %100 = arith.subf %98, %99 : vector<8x128xf32>
      %101 = arith.mulf %96, %100 : vector<8x128xf32>
      %102 = arith.mulf %101, %89 : vector<8x128xf32>
      %103 = arith.addf %59, %102 : vector<8x128xf32>
      %104 = math.log %83 : vector<8x128xf32>
      %105 = arith.mulf %15, %104 : vector<8x128xf32>
      %106 = arith.mulf %73, %19 : vector<8x128xf32>
      %107 = arith.addf %105, %106 : vector<8x128xf32>
      %108 = math.exp %107 : vector<8x128xf32>
      %cst_42 = arith.constant 1.000000e+00 : f32
      %109 = vector.broadcast %cst_42 : f32 to vector<8x128xf32>
      %110 = arith.addf %59, %109 : vector<8x128xf32>
      %111 = math.log %110 : vector<8x128xf32>
      %112 = arith.mulf %17, %111 : vector<8x128xf32>
      %113 = math.exp %112 : vector<8x128xf32>
      %cst_43 = arith.constant 1.000000e+00 : f32
      %114 = vector.broadcast %cst_43 : f32 to vector<8x128xf32>
      %115 = arith.subf %113, %114 : vector<8x128xf32>
      %116 = arith.mulf %13, %108 : vector<8x128xf32>
      %117 = arith.mulf %116, %115 : vector<8x128xf32>
      %cst_44 = arith.constant 1.000000e+00 : f32
      %118 = vector.broadcast %cst_44 : f32 to vector<8x128xf32>
      %119 = arith.cmpf ogt, %56, %118 : vector<8x128xf32>
      %120 = arith.select %119, %103, %117 : vector<8x128xi1>, vector<8x128xf32>
      %cst_45 = arith.constant 1.000000e-01 : f32
      %cst_46 = arith.constant 3.650000e+04 : f32
      %121 = vector.broadcast %cst_45 : f32 to vector<8x128xf32>
      %122 = arith.maximumf %121, %120 : vector<8x128xf32>
      %123 = vector.broadcast %cst_46 : f32 to vector<8x128xf32>
      %124 = arith.minimumf %123, %122 : vector<8x128xf32>
      %cst_47 = arith.constant 1.000000e+00 : f32
      %125 = vector.broadcast %cst_47 : f32 to vector<8x128xf32>
      %126 = arith.cmpf oeq, %56, %125 : vector<8x128xf32>
      %cst_48 = arith.constant 2.000000e+00 : f32
      %127 = vector.broadcast %cst_48 : f32 to vector<8x128xf32>
      %128 = arith.cmpf oeq, %56, %127 : vector<8x128xf32>
      %cst_49 = arith.constant 3.000000e+00 : f32
      %129 = vector.broadcast %cst_49 : f32 to vector<8x128xf32>
      %130 = arith.cmpf oeq, %56, %129 : vector<8x128xf32>
      %cst_50 = arith.constant 4.000000e+00 : f32
      %131 = vector.broadcast %cst_50 : f32 to vector<8x128xf32>
      %132 = arith.cmpf oeq, %56, %131 : vector<8x128xf32>
      %cst_51 = arith.constant 1.000000e+00 : f32
      %133 = vector.broadcast %46 : f32 to vector<8x128xf32>
      %134 = vector.broadcast %cst_51 : f32 to vector<8x128xf32>
      %135 = arith.select %132, %133, %134 : vector<8x128xi1>, vector<8x128xf32>
      %136 = vector.broadcast %45 : f32 to vector<8x128xf32>
      %137 = arith.select %130, %136, %135 : vector<8x128xi1>, vector<8x128xf32>
      %138 = vector.broadcast %44 : f32 to vector<8x128xf32>
      %139 = arith.select %128, %138, %137 : vector<8x128xi1>, vector<8x128xf32>
      %140 = vector.broadcast %43 : f32 to vector<8x128xf32>
      %141 = arith.select %126, %140, %139 : vector<8x128xi1>, vector<8x128xf32>
      %cst_52 = arith.constant 1.000000e-01 : f32
      %cst_53 = arith.constant 3.650000e+04 : f32
      %142 = vector.broadcast %cst_52 : f32 to vector<8x128xf32>
      %143 = arith.maximumf %142, %141 : vector<8x128xf32>
      %144 = vector.broadcast %cst_53 : f32 to vector<8x128xf32>
      %145 = arith.minimumf %144, %143 : vector<8x128xf32>
      %cst_54 = arith.constant 3.000000e+00 : f32
      %146 = vector.broadcast %cst_54 : f32 to vector<8x128xf32>
      %147 = arith.subf %56, %146 : vector<8x128xf32>
      %148 = vector.broadcast %48 : f32 to vector<8x128xf32>
      %149 = arith.mulf %148, %147 : vector<8x128xf32>
      %150 = vector.broadcast %47 : f32 to vector<8x128xf32>
      %151 = arith.subf %150, %149 : vector<8x128xf32>
      %cst_55 = arith.constant 1.000000e+00 : f32
      %cst_56 = arith.constant 1.000000e+01 : f32
      %152 = vector.broadcast %cst_55 : f32 to vector<8x128xf32>
      %153 = arith.maximumf %152, %151 : vector<8x128xf32>
      %154 = vector.broadcast %cst_56 : f32 to vector<8x128xf32>
      %155 = arith.minimumf %154, %153 : vector<8x128xf32>
      %156 = arith.select %58, %145, %124 : vector<8x128xf32>
      %157 = arith.select %58, %155, %83 : vector<8x128xf32>
      %c0_57 = arith.constant 0 : index
      %c0_58 = arith.constant 0 : index
      %c0_59 = arith.constant 0 : index
      %c0_60 = arith.constant 0 : index
      %158 = vector.load %arg6[%c0_57, %c0_58, %c0_59, %c0_60] : memref<8x2x8x128xf32, #tpu.memory_space<vmem>>, vector<1x1x8x128xf32>
      %159 = vector.shape_cast %158 : vector<1x1x8x128xf32> to vector<8x128xf32>
      %160 = vector.shape_cast %156 : vector<8x128xf32> to vector<1x1x8x128xf32>
      tpu.vector_store %arg6[%c0_57, %c0_58, %c0_59, %c0_60], %160 {strides = array<i32>} : memref<8x2x8x128xf32, #tpu.memory_space<vmem>>, vector<1x1x8x128xf32>,
      %c0_61 = arith.constant 0 : index
      %c1_62 = arith.constant 1 : index
      %c0_63 = arith.constant 0 : index
      %c0_64 = arith.constant 0 : index
      %161 = vector.load %arg6[%c0_61, %c1_62, %c0_63, %c0_64] : memref<8x2x8x128xf32, #tpu.memory_space<vmem>>, vector<1x1x8x128xf32>
      %162 = vector.shape_cast %161 : vector<1x1x8x128xf32> to vector<8x128xf32>
      %163 = vector.shape_cast %157 : vector<8x128xf32> to vector<1x1x8x128xf32>
      tpu.vector_store %arg6[%c0_61, %c1_62, %c0_63, %c0_64], %163 {strides = array<i32>} : memref<8x2x8x128xf32, #tpu.memory_space<vmem>>, vector<1x1x8x128xf32>,
      %c0_65 = arith.constant 0 : index
      %c0_66 = arith.constant 0 : index
      %c0_67 = arith.constant 0 : index
      %164 = vector.load %arg7[%c0_65, %c0_66, %c0_67] : memref<2x8x128xf32, #tpu.memory_space<vmem>>, vector<1x8x128xf32>
      %165 = vector.shape_cast %164 : vector<1x8x128xf32> to vector<8x128xf32>
      %166 = vector.shape_cast %156 : vector<8x128xf32> to vector<1x8x128xf32>
      tpu.vector_store %arg7[%c0_65, %c0_66, %c0_67], %166 {strides = array<i32>} : memref<2x8x128xf32, #tpu.memory_space<vmem>>, vector<1x8x128xf32>,
      %c1_68 = arith.constant 1 : index
      %c0_69 = arith.constant 0 : index
      %c0_70 = arith.constant 0 : index
      %167 = vector.load %arg7[%c1_68, %c0_69, %c0_70] : memref<2x8x128xf32, #tpu.memory_space<vmem>>, vector<1x8x128xf32>
      %168 = vector.shape_cast %167 : vector<1x8x128xf32> to vector<8x128xf32>
      %169 = vector.shape_cast %157 : vector<8x128xf32> to vector<1x8x128xf32>
      tpu.vector_store %arg7[%c1_68, %c0_69, %c0_70], %169 {strides = array<i32>} : memref<2x8x128xf32, #tpu.memory_space<vmem>>, vector<1x8x128xf32>,
    } else {
    }
    %c0_i32_1 = arith.constant 0 : i32
    %28 = arith.cmpi eq, %arg1, %c0_i32_1 : i32
    %c1_i32 = arith.constant 1 : i32
    %c0_i32_2 = arith.constant 0 : i32
    %29 = arith.select %28, %c1_i32, %c0_i32_2 : i32
    %c0 = arith.constant 0 : index
    %c0_3 = arith.constant 0 : index
    %c0_4 = arith.constant 0 : index
    %30 = vector.load %arg7[%c0, %c0_3, %c0_4] : memref<2x8x128xf32, #tpu.memory_space<vmem>>, vector<1x8x128xf32>
    %31 = vector.shape_cast %30 : vector<1x8x128xf32> to vector<8x128xf32>
    %c1 = arith.constant 1 : index
    %c0_5 = arith.constant 0 : index
    %c0_6 = arith.constant 0 : index
    %32 = vector.load %arg7[%c1, %c0_5, %c0_6] : memref<2x8x128xf32, #tpu.memory_space<vmem>>, vector<1x8x128xf32>
    %33 = vector.shape_cast %32 : vector<1x8x128xf32> to vector<8x128xf32>
    %c8_i32 = arith.constant 8 : i32
    %34 = arith.subi %c8_i32, %29 : i32
    %35 = arith.addi %29, %34 : i32
    %c1_i32_7 = arith.constant 1 : i32
    %36:2 = scf.for %arg8 = %29 to %35 step %c1_i32_7 iter_args(%arg9 = %31, %arg10 = %33) -> (vector<8x128xf32>, vector<8x128xf32>)  : i32 {
      %43 = arith.index_cast %arg8 : i32 to index
      %c0_14 = arith.constant 0 : index
      %c0_15 = arith.constant 0 : index
      %c0_16 = arith.constant 0 : index
      %44 = vector.load %arg4[%43, %c0_14, %c0_15, %c0_16] : memref<8x2x8x128xf32, #tpu.memory_space<vmem>>, vector<1x1x8x128xf32>
      %45 = vector.shape_cast %44 : vector<1x1x8x128xf32> to vector<8x128xf32>
      %46 = arith.index_cast %arg8 : i32 to index
      %c1_17 = arith.constant 1 : index
      %c0_18 = arith.constant 0 : index
      %c0_19 = arith.constant 0 : index
      %47 = vector.load %arg4[%46, %c1_17, %c0_18, %c0_19] : memref<8x2x8x128xf32, #tpu.memory_space<vmem>>, vector<1x1x8x128xf32>
      %48 = vector.shape_cast %47 : vector<1x1x8x128xf32> to vector<8x128xf32>
      %cst_20 = arith.constant 9.000000e+00 : f32
      %49 = vector.broadcast %cst_20 : f32 to vector<8x128xf32>
      %50 = arith.mulf %49, %arg9 : vector<8x128xf32>
      %51 = arith.addf %50, %45 : vector<8x128xf32>
      %52 = tpu.reciprocal %51 {approx = true} : vector<8x128xf32> -> vector<8x128xf32>
      %53 = arith.mulf %51, %52 : vector<8x128xf32>
      %cst_21 = arith.constant 2.000000e+00 : f32
      %54 = vector.broadcast %cst_21 : f32 to vector<8x128xf32>
      %55 = arith.subf %54, %53 : vector<8x128xf32>
      %56 = arith.mulf %52, %55 : vector<8x128xf32>
      %57 = arith.mulf %51, %56 : vector<8x128xf32>
      %cst_22 = arith.constant 2.000000e+00 : f32
      %58 = vector.broadcast %cst_22 : f32 to vector<8x128xf32>
      %59 = arith.subf %58, %57 : vector<8x128xf32>
      %60 = arith.mulf %56, %59 : vector<8x128xf32>
      %61 = arith.mulf %50, %60 : vector<8x128xf32>
      %62 = arith.subf %24, %61 : vector<8x128xf32>
      %cst_23 = arith.constant 3.000000e+00 : f32
      %63 = vector.broadcast %cst_23 : f32 to vector<8x128xf32>
      %64 = arith.subf %48, %63 : vector<8x128xf32>
      %65 = arith.mulf %1, %64 : vector<8x128xf32>
      %66 = arith.subf %arg10, %65 : vector<8x128xf32>
      %67 = arith.mulf %5, %66 : vector<8x128xf32>
      %68 = arith.addf %3, %67 : vector<8x128xf32>
      %cst_24 = arith.constant 1.000000e+00 : f32
      %cst_25 = arith.constant 1.000000e+01 : f32
      %69 = vector.broadcast %cst_24 : f32 to vector<8x128xf32>
      %70 = arith.maximumf %69, %68 : vector<8x128xf32>
      %71 = vector.broadcast %cst_25 : f32 to vector<8x128xf32>
      %72 = arith.minimumf %71, %70 : vector<8x128xf32>
      %cst_26 = arith.constant 2.000000e+00 : f32
      %73 = vector.broadcast %cst_26 : f32 to vector<8x128xf32>
      %74 = arith.cmpf oeq, %48, %73 : vector<8x128xf32>
      %cst_27 = arith.constant 4.000000e+00 : f32
      %75 = vector.broadcast %cst_27 : f32 to vector<8x128xf32>
      %76 = arith.cmpf oeq, %48, %75 : vector<8x128xf32>
      %77 = arith.select %76, %23, %24 : vector<8x128xi1>, vector<8x128xf32>
      %78 = arith.select %74, %21, %77 : vector<8x128xi1>, vector<8x128xf32>
      %79 = math.log %arg9 : vector<8x128xf32>
      %80 = arith.mulf %9, %79 : vector<8x128xf32>
      %81 = math.exp %80 : vector<8x128xf32>
      %cst_28 = arith.constant 1.100000e+01 : f32
      %82 = vector.broadcast %cst_28 : f32 to vector<8x128xf32>
      %83 = arith.subf %82, %72 : vector<8x128xf32>
      %84 = arith.mulf %7, %83 : vector<8x128xf32>
      %85 = arith.mulf %84, %81 : vector<8x128xf32>
      %86 = arith.mulf %62, %11 : vector<8x128xf32>
      %87 = math.exp %86 : vector<8x128xf32>
      %cst_29 = arith.constant 1.000000e+00 : f32
      %88 = vector.broadcast %cst_29 : f32 to vector<8x128xf32>
      %89 = arith.subf %87, %88 : vector<8x128xf32>
      %90 = arith.mulf %85, %89 : vector<8x128xf32>
      %91 = arith.mulf %90, %78 : vector<8x128xf32>
      %92 = arith.addf %arg9, %91 : vector<8x128xf32>
      %93 = math.log %72 : vector<8x128xf32>
      %94 = arith.mulf %15, %93 : vector<8x128xf32>
      %95 = arith.mulf %62, %19 : vector<8x128xf32>
      %96 = arith.addf %94, %95 : vector<8x128xf32>
      %97 = math.exp %96 : vector<8x128xf32>
      %cst_30 = arith.constant 1.000000e+00 : f32
      %98 = vector.broadcast %cst_30 : f32 to vector<8x128xf32>
      %99 = arith.addf %arg9, %98 : vector<8x128xf32>
      %100 = math.log %99 : vector<8x128xf32>
      %101 = arith.mulf %17, %100 : vector<8x128xf32>
      %102 = math.exp %101 : vector<8x128xf32>
      %cst_31 = arith.constant 1.000000e+00 : f32
      %103 = vector.broadcast %cst_31 : f32 to vector<8x128xf32>
      %104 = arith.subf %102, %103 : vector<8x128xf32>
      %105 = arith.mulf %13, %97 : vector<8x128xf32>
      %106 = arith.mulf %105, %104 : vector<8x128xf32>
      %cst_32 = arith.constant 1.000000e+00 : f32
      %107 = vector.broadcast %cst_32 : f32 to vector<8x128xf32>
      %108 = arith.cmpf ogt, %48, %107 : vector<8x128xf32>
      %109 = arith.select %108, %92, %106 : vector<8x128xi1>, vector<8x128xf32>
      %cst_33 = arith.constant 1.000000e-01 : f32
      %cst_34 = arith.constant 3.650000e+04 : f32
      %110 = vector.broadcast %cst_33 : f32 to vector<8x128xf32>
      %111 = arith.maximumf %110, %109 : vector<8x128xf32>
      %112 = vector.broadcast %cst_34 : f32 to vector<8x128xf32>
      %113 = arith.minimumf %112, %111 : vector<8x128xf32>
      %114 = arith.index_cast %arg8 : i32 to index
      %c0_35 = arith.constant 0 : index
      %c0_36 = arith.constant 0 : index
      %c0_37 = arith.constant 0 : index
      %115 = vector.load %arg6[%114, %c0_35, %c0_36, %c0_37] : memref<8x2x8x128xf32, #tpu.memory_space<vmem>>, vector<1x1x8x128xf32>
      %116 = vector.shape_cast %115 : vector<1x1x8x128xf32> to vector<8x128xf32>
      %117 = vector.shape_cast %113 : vector<8x128xf32> to vector<1x1x8x128xf32>
      tpu.vector_store %arg6[%114, %c0_35, %c0_36, %c0_37], %117 {strides = array<i32>} : memref<8x2x8x128xf32, #tpu.memory_space<vmem>>, vector<1x1x8x128xf32>,
      %118 = arith.index_cast %arg8 : i32 to index
      %c1_38 = arith.constant 1 : index
      %c0_39 = arith.constant 0 : index
      %c0_40 = arith.constant 0 : index
      %119 = vector.load %arg6[%118, %c1_38, %c0_39, %c0_40] : memref<8x2x8x128xf32, #tpu.memory_space<vmem>>, vector<1x1x8x128xf32>
      %120 = vector.shape_cast %119 : vector<1x1x8x128xf32> to vector<8x128xf32>
      %121 = vector.shape_cast %72 : vector<8x128xf32> to vector<1x1x8x128xf32>
      tpu.vector_store %arg6[%118, %c1_38, %c0_39, %c0_40], %121 {strides = array<i32>} : memref<8x2x8x128xf32, #tpu.memory_space<vmem>>, vector<1x1x8x128xf32>,
      scf.yield %113, %72 : vector<8x128xf32>, vector<8x128xf32>
    }
    %c0_8 = arith.constant 0 : index
    %c0_9 = arith.constant 0 : index
    %c0_10 = arith.constant 0 : index
    %37 = vector.load %arg7[%c0_8, %c0_9, %c0_10] : memref<2x8x128xf32, #tpu.memory_space<vmem>>, vector<1x8x128xf32>
    %38 = vector.shape_cast %37 : vector<1x8x128xf32> to vector<8x128xf32>
    %39 = vector.shape_cast %36#0 : vector<8x128xf32> to vector<1x8x128xf32>
    tpu.vector_store %arg7[%c0_8, %c0_9, %c0_10], %39 {strides = array<i32>} : memref<2x8x128xf32, #tpu.memory_space<vmem>>, vector<1x8x128xf32>,
    %c1_11 = arith.constant 1 : index
    %c0_12 = arith.constant 0 : index
    %c0_13 = arith.constant 0 : index
    %40 = vector.load %arg7[%c1_11, %c0_12, %c0_13] : memref<2x8x128xf32, #tpu.memory_space<vmem>>, vector<1x8x128xf32>
    %41 = vector.shape_cast %40 : vector<1x8x128xf32> to vector<8x128xf32>
    %42 = vector.shape_cast %36#1 : vector<8x128xf32> to vector<1x8x128xf32>
    tpu.vector_store %arg7[%c1_11, %c0_12, %c0_13], %42 {strides = array<i32>} : memref<2x8x128xf32, #tpu.memory_space<vmem>>, vector<1x8x128xf32>,
    return
  }
  func.func @transform_0(%arg0: i32, %arg1: i32) -> i32 {
    %c0_i32 = arith.constant 0 : i32
    %c0_i32_0 = arith.constant 0 : i32
    return %c0_i32 : i32
  }
  func.func @transform_1(%arg0: i32, %arg1: i32) -> i32 {
    %c0_i32 = arith.constant 0 : i32
    %c0_i32_0 = arith.constant 0 : i32
    return %c0_i32 : i32
  }
  func.func @transform_2(%arg0: i32, %arg1: i32) -> (i32, i32, i32, i32) {
    %c0_i32 = arith.constant 0 : i32
    %c0_i32_0 = arith.constant 0 : i32
    %c0_i32_1 = arith.constant 0 : i32
    return %arg1, %c0_i32, %arg0, %c0_i32_0 : i32, i32, i32, i32
  }
  func.func @transform_3(%arg0: i32, %arg1: i32) -> (i32, i32, i32) {
    %c0_i32 = arith.constant 0 : i32
    %c0_i32_0 = arith.constant 0 : i32
    %c0_i32_1 = arith.constant 0 : i32
    return %c0_i32, %arg0, %c0_i32_0 : i32, i32, i32
  }
  func.func @transform_4(%arg0: i32, %arg1: i32) -> (i32, i32, i32, i32) {
    %c0_i32 = arith.constant 0 : i32
    %c0_i32_0 = arith.constant 0 : i32
    %c0_i32_1 = arith.constant 0 : i32
    return %arg1, %c0_i32, %arg0, %c0_i32_0 : i32, i32, i32, i32
  }
}

</mosaic_0001>

<bundles_post_ra>
// kernel: fsrs_forward.1
= control target key start
LH: loop header
LB: loop body
LE: loop exit
PB: predicated region body
PF: predicated region fallthrough
CT: control target
= control target key end

     0   :  { %10 = vsyncpa [#allocation5], 0  ;;  %s596_s0 = inlined_call_operand.vmem [shape: f32[18], index: 0, kind: input, shape index: {}]   ;;  %s597_s1 = inlined_call_operand.<no memory space> [shape: s32[1], index: 1, kind: input, shape index: {}]   ;;  %s598_s2 = inlined_call_operand.vmem [shape: f32[8,2,8,128], index: 2, kind: input, shape index: {}]   ;;  %s599_s3 = inlined_call_operand.vmem [shape: f32[2,8,128], index: 3, kind: input, shape index: {}]   ;;  %s600_s4 = inlined_call_operand.vmem [shape: f32[8,2,8,128], index: 4, kind: output, shape index: {}]  }
   0x1   :  { %s17_s17 = sshll.u32 %s596_s0, 4  ;;  %s18_s17 = int_to_ptr.vmem [resolvable:$true] %s17_s17 }
   0x2   :  { %s355_s18 = scalar_lea.vmem %s18_s17, 16  ;;  %p360_p1 = scmp.lt.s32.totalorder %s18_s17, %s18_s17 }
   0x3   :  { %p356_p0 = scmp.ne.s32.totalorder %s18_s17, %s355_s18  ;;  %p361_p2 = scmp.lt.s32.totalorder %s355_s18, %s355_s18 }
   0x5   :  { %p362_p3 = por %p361_p2, %p360_p1 }
   0x7   :  { %p363_p4 = pnand %p362_p3, %p356_p0 }
   0x9   :  { %366 = shalt.err (!%p363_p4)
}
   0xa   :  { %s393_s19 = smov [#allocation4]  }
   0xb   :  { %20 = dma.vmem_to_smem %s18_s17, 16, %s393_s19, [#allocation5]  }
   0xc   :  { %379 = dma.done.wait [#allocation5], 16  }
   0xd   :  { %380 = vsyncadd [#allocation5], 4294967280 }
   0xe   :  { %30 = sfence }
   0xf   :  { %s422_s20 = sld [smem:[#allocation4 + $0x6]]  ;;  %v427_v0 = vld [vmem:[%s598_s2 + $0x8] sm:$0xff]  ;;  %p72_p5 = scmp.ne.s32.totalorder %s597_s1, 0  ;;  %v65_v7 = vld [vmem:[%s599_s3] sm:$0xff] }
  0x10   :  { %v286_v1 = vadd.f32 -3.0, %v427_v0  ;;  %s431_s0 = sld [smem:[#allocation4 + $0x8]]  ;;  %v284_v4 = vld [vmem:[%s599_s3 + $0x8] sm:$0xff]  ;;  %v68_v12 = vld [vmem:[%s598_s2] sm:$0xff]  ;;  %vm96_vm1 = vcmp.eq.f32.partialorder %v427_v0, 4.0  ;;  %vm135_vm2 = vcmp.eq.f32.partialorder %v427_v0, 3.0 }
  0x11   :  { %s435_s23 = sld [smem:[#allocation4 + $0x7]]  ;;  %vm95_vm3 = vcmp.eq.f32.partialorder %v427_v0, 2.0  ;;  %vm134_vm4 = vcmp.eq.f32.partialorder %v427_v0, 1.0  ;;  %vm130_vm5 = vcmp.gt.f32.partialorder %v427_v0, 1.0  ;;  %s535_s26 = smov 1  }
  0x12   :  { %s73_s28 = scalar_select %p72_p5, 1, 0 }
  0x13   :  { %s282_s5 = sld [smem:[#allocation4 + $0x4]] }
  0x14   :  { %v74_v10 = vstv %s73_s28  ;;  %s283_s6 = sld [smem:[#allocation4 + $0x5]] }
  0x15   :  { %v32_v2 = vstv %s422_s20  ;;  %vm450_vm0 = vcmp.eq.s32.totalorder %v74_v10, 1  ;;  %s474_s9 = sld [smem:[#allocation4 + $0xa]] }
  0x16   :  { %v89_v3 = vmul.f32 %v286_v1, %v32_v2  ;;  %v36_v6 = vstv %s431_s0  ;;  %v459_v13 = vsel %vm450_vm0, 1.0, %v65_v7  ;;  %s476_s10 = sld [smem:[#allocation4 + $0xe]] }
  0x17   :  { %v34_v9 = vstv %s435_s23  ;;  %v77_v14 = vmul.f32 9.0, %v459_v13  ;;  %v121_v20 = vadd.f32 1.0, %v459_v13  ;;  %s478_s11 = sld [smem:[#allocation4 + $0xd]] }
  0x18   :  { %v90_v5 = vsub.f32 %v284_v4, %v89_v3  ;;  %s480_s12 = sld [smem:[#allocation4 + $0xb]] }
  0x19   :  { %v78_v16 = vadd.f32 %v77_v14, %v68_v12  ;;  %v148_v18 = vstv %s282_s5  ;;  %s483_s13 = sld [smem:[#allocation4 + $0xf]] }
  0x1a   :  { %v91_v8 = vmul.f32 %v90_v5, %v36_v6  ;;  %v146_v17 = vstv %s283_s6  ;;  %s281_s14 = sld [smem:[#allocation4 + $0x3]] }
  0x1b   :  { %323 = vrcp.f32 %v78_v16  ;;  %v147_v21 = vmul.f32 %v286_v1, %v146_v17  ;;  %v40_v34 = vstv %s474_s9  ;;  %s499_s15 = sld [smem:[#allocation4 + $0x9]] }
  0x1c   :  { %v92_v15 = vadd.f32 %v91_v8, %v34_v9  ;;  %325 = vlog2.f32 %v459_v13  ;;  %v48_v38 = vstv %s476_s10  ;;  %s280_s16 = sld [smem:[#allocation4 + $0x2]] }
  0x1d   :  { %v149_v22 = vsub.f32 %v148_v18, %v147_v21  ;;  %327 = vlog2.f32 %v121_v20  ;;  %v46_v44 = vstv %s478_s11  ;;  %s501_s17 = sld [smem:[#allocation4 + $0x11]] }
  0x1e   :  { %v93_v19 = vmax.f32 %v92_v15, 1.0  ;;  %v42_v47 = vstv %s480_s12  ;;  %s279_s18 = sld [smem:[#allocation4 + $0x1]] }
  0x1f   :  { %v150_v24 = vmax.f32 %v149_v22, 1.0  ;;  %v50_v48 = vstv %s483_s13  ;;  %s503_s19 = sld [smem:[#allocation4 + $0xc]] }
  0x20   :  { %v94_v23 = vmin.f32 %v93_v19, 10.0  ;;  %s505_s21 = sld [smem:[#allocation4 + $0x10]]  ;;  %v136_v58 = vstv %s281_s14 }
  0x21   :  { %v151_v25 = vmin.f32 %v150_v24, 10.0  ;;  %v38_v59 = vstv %s499_s15  ;;  %s59_s22 = sld [smem:[#allocation4]]  ;;  %v137_v60 = vsel %vm96_vm1, %v136_v58, 1.0 }
  0x22   :  { %329 = vlog2.f32 %v94_v23  ;;  %v104_v57 = vsub.f32 11.0, %v94_v23  ;;  %v138_v61 = vstv %s280_s16 }
  0x23   :  { %v468_v26 = vsel %vm450_vm0, %v151_v25, %v94_v23   ;;  %v54_v1 = vstv %s501_s17  ;;  %v139_v3 = vsel %vm135_vm2, %v138_v61, %v137_v60 }
  0x24   :  { %289 = vst [vmem:[%s600_s4 + $0x8] sm:$0xff] %v468_v26  ;;  %v105_v62 = vmul.f32 %v104_v57, %v38_v59  ;;  %v140_v4 = vstv %s279_s18  ;;  %v97_v8 = vsel %vm96_vm1, %v54_v1, 1.0 }
  0x25   :  { %v141_v15 = vsel %vm95_vm3, %v140_v4, %v139_v3 }
  0x26   :  { %v52_v7 = vstv %s505_s21 }
  0x27   :  { %v98_v20 = vsel %vm95_vm3, %v52_v7, %v97_v8 }
  0x28   :  { %v324_v27 = vpop.eup %323 }
  0x29   :  { %v80_v28 = vmul.f32 %v324_v27, %v78_v16  ;;  %v326_v29 = vpop.eup %325 }
  0x2a   :  { %v328_v31 = vpop.eup %327  ;;  %v100_v33 = vmul.f32 0.6931472, %v326_v29 }
  0x2b   :  { %v81_v30 = vsub.f32 2.0, %v80_v28  ;;  %v123_v36 = vmul.f32 0.6931472, %v328_v31 }
  0x2c   :  { %v101_v40 = vmul.f32 %v100_v33, %v40_v34 }
  0x2d   :  { %v82_v32 = vmul.f32 %v324_v27, %v81_v30  ;;  %v124_v43 = vmul.f32 %v123_v36, %v48_v38 }
  0x2e   :  { %v102_v46 = vmul.f32 1.442695, %v101_v40 }
  0x2f   :  { %v83_v35 = vmul.f32 %v82_v32, %v78_v16  ;;  %v330_v37 = vpop.eup %329  ;;  %v125_v51 = vmul.f32 1.442695, %v124_v43  ;;  %v142_v16 = vstv %s59_s22 }
  0x30   :  { %v115_v42 = vmul.f32 0.6931472, %v330_v37  ;;  %331 = vpow2.f32 %v102_v46  ;;  %v143_v23 = vsel %vm134_vm4, %v142_v16, %v141_v15 }
  0x31   :  { %v84_v39 = vsub.f32 2.0, %v83_v35  ;;  %333 = vpow2.f32 %v125_v51  ;;  %v144_v27 = vmax.f32 %v143_v23, 0.1 }
  0x32   :  { %v116_v50 = vmul.f32 %v115_v42, %v46_v44 }
  0x33   :  { %v85_v41 = vmul.f32 %v84_v39, %v82_v32  ;;  %v145_v31 = vmin.f32 %v144_v27, 36500.0 }
  0x35   :  { %v86_v45 = vmul.f32 %v85_v41, %v77_v14  ;;  %v44_v14 = vstv %s503_s19 }
  0x37   :  { %v87_v49 = vsub.f32 1.0, %v86_v45 }
  0x39   :  { %v107_v52 = vmul.f32 %v87_v49, %v42_v47  ;;  %v117_v53 = vmul.f32 %v87_v49, %v50_v48 }
  0x3b   :  { %v108_v54 = vmul.f32 1.442695, %v107_v52  ;;  %v118_v55 = vadd.f32 %v117_v53, %v116_v50 }
  0x3d   :  { %335 = vpow2.f32 %v108_v54  ;;  %v119_v56 = vmul.f32 1.442695, %v118_v55  ;;  %v332_v63 = vpop.eup %331 }
  0x3e   :  { %v334_v5 = vpop.eup %333  ;;  %v106_v10 = vmul.f32 %v332_v63, %v105_v62 }
  0x3f   :  { %337 = vpow2.f32 %v119_v56  ;;  %v288_v18 = vadd.f32 -1.0, %v334_v5 }
  0x4a   :  { %v336_v12 = vpop.eup %335 }
  0x4b   :  { %v287_v17 = vadd.f32 -1.0, %v336_v12 }
  0x4c   :  { %v338_v19 = vpop.eup %337 }
  0x4d   :  { %v111_v21 = vmul.f32 %v287_v17, %v106_v10  ;;  %v128_v22 = vmul.f32 %v338_v19, %v44_v14 }
  0x4f   :  { %v112_v24 = vmul.f32 %v111_v21, %v98_v20  ;;  %v129_v25 = vmul.f32 %v288_v18, %v128_v22 }
  0x51   :  { %v113_v28 = vadd.f32 %v112_v24, %v459_v13 }
  0x53   :  { %v131_v29 = vsel %vm130_vm5, %v113_v28, %v129_v25 }
  0x54   :  { %v132_v30 = vmax.f32 %v131_v29, 0.1 }
  0x56   :  { %v133_v32 = vmin.f32 %v132_v30, 36500.0 }
  0x58   :  { %v152_v33 = vsel %vm450_vm0, %v145_v31, %v133_v32  }
  0x59   :  { %154 = vst [vmem:[%s600_s4] sm:$0xff] %v152_v33 }
  0x5a LB: > { %s290_s27 = sshll.u32 %s391_s26, 4  ;;  %v178_v0 = vmul.f32 9.0, %v387_v33  ;;  %v222_v39 = vadd.f32 1.0, %v387_v33  ;;  %s167_s26 = sadd.s32 1, %s391_s26   ;;  %s391_s26 = sphi %s535_s26, %s167_s26   ;;  %v387_v33 = vphi %v152_v33, %v234_v33   ;;  %v383_v26 = vphi %v468_v26, %v195_v26  }
  0x5b   : > { %s173_s30 = scalar_lea.vmem %s598_s2, %s290_s27  ;;  %s563_s7 = scalar_lea.vmem %s600_s4, %s290_s27 }
  0x5c   : > { %v174_v11 = vld [vmem:[%s173_s30] sm:$0xff]  ;;  %v549_v13 = vld [vmem:[%s173_s30 + $0x8] sm:$0xff]  ;;  %p166_p6 = scmp.ge.s32.totalorder %s167_s26, 8 }
  0x5d   : > { %v179_v35 = vadd.f32 %v178_v0, %v174_v11  ;;  %v293_v36 = vadd.f32 -3.0, %v549_v13  ;;  %vm197_vm6 = vcmp.eq.f32.partialorder %v549_v13, 4.0  ;;  %vm196_vm7 = vcmp.eq.f32.partialorder %v549_v13, 2.0 }
  0x5e   : > { %v198_v22 = vsel %vm197_vm6, %v54_v1, 1.0  ;;  %vm231_vm8 = vcmp.gt.f32.partialorder %v549_v13, 1.0 }
  0x5f   : > { %339 = vrcp.f32 %v179_v35  ;;  %v190_v37 = vmul.f32 %v293_v36, %v32_v2  ;;  %v199_v29 = vsel %vm196_vm7, %v52_v7, %v198_v22 }
  0x60   : > { %341 = vlog2.f32 %v387_v33 }
  0x61   : > { %v191_v40 = vsub.f32 %v383_v26, %v190_v37  ;;  %343 = vlog2.f32 %v222_v39 }
  0x63   : > { %v192_v41 = vmul.f32 %v191_v40, %v36_v6 }
  0x65   : > { %v193_v42 = vadd.f32 %v192_v41, %v34_v9 }
  0x67   : > { %v194_v43 = vmax.f32 %v193_v42, 1.0 }
  0x69   : > { %v195_v26 = vmin.f32 %v194_v43, 10.0  }
  0x6b   : > { %345 = vlog2.f32 %v195_v26  ;;  %297 = vst [vmem:[%s563_s7 + $0x8] sm:$0xff] %v195_v26  ;;  %v205_v18 = vsub.f32 11.0, %v195_v26 }
  0x6c   : > { %v340_v45 = vpop.eup %339 }
  0x6d   : > { %v181_v46 = vmul.f32 %v340_v45, %v179_v35  ;;  %v342_v49 = vpop.eup %341  ;;  %v206_v19 = vmul.f32 %v205_v18, %v38_v59 }
  0x6e   : > { %v344_v51 = vpop.eup %343  ;;  %v201_v53 = vmul.f32 0.6931472, %v342_v49 }
  0x6f   : > { %v182_v50 = vsub.f32 2.0, %v181_v46  ;;  %v224_v55 = vmul.f32 0.6931472, %v344_v51 }
  0x70   : > { %v202_v57 = vmul.f32 %v201_v53, %v40_v34 }
  0x71   : > { %v183_v52 = vmul.f32 %v340_v45, %v182_v50  ;;  %v225_v60 = vmul.f32 %v224_v55, %v48_v38 }
  0x72   : > { %v203_v63 = vmul.f32 1.442695, %v202_v57 }
  0x73   : > { %v184_v54 = vmul.f32 %v183_v52, %v179_v35  ;;  %v226_v8 = vmul.f32 1.442695, %v225_v60 }
  0x74   : > { %347 = vpow2.f32 %v203_v63 }
  0x75   : > { %v185_v56 = vsub.f32 2.0, %v184_v54  ;;  %349 = vpow2.f32 %v226_v8 }
  0x77   : > { %v186_v58 = vmul.f32 %v185_v56, %v183_v52 }
  0x78   : > { %v346_v61 = vpop.eup %345 }
  0x79   : > { %v187_v62 = vmul.f32 %v186_v58, %v178_v0  ;;  %v216_v3 = vmul.f32 0.6931472, %v346_v61 }
  0x7b   : > { %v188_v4 = vsub.f32 1.0, %v187_v62  ;;  %v217_v5 = vmul.f32 %v216_v3, %v46_v44 }
  0x7d   : > { %v208_v10 = vmul.f32 %v188_v4, %v42_v47  ;;  %v218_v12 = vmul.f32 %v188_v4, %v50_v48 }
  0x7f   : > { %v209_v15 = vmul.f32 1.442695, %v208_v10  ;;  %v219_v16 = vadd.f32 %v218_v12, %v217_v5 }
  0x81   : > { %351 = vpow2.f32 %v209_v15  ;;  %v220_v17 = vmul.f32 1.442695, %v219_v16  ;;  %v348_v20 = vpop.eup %347 }
  0x82   : > { %v350_v21 = vpop.eup %349  ;;  %v207_v23 = vmul.f32 %v348_v20, %v206_v19 }
  0x83   : > { %353 = vpow2.f32 %v220_v17  ;;  %v295_v27 = vadd.f32 -1.0, %v350_v21 }
  0x8e   : > { %v352_v24 = vpop.eup %351 }
  0x8f   : > { %v294_v25 = vadd.f32 -1.0, %v352_v24 }
  0x90   : > { %v354_v28 = vpop.eup %353 }
  0x91   : > { %v212_v30 = vmul.f32 %v294_v25, %v207_v23  ;;  %v229_v31 = vmul.f32 %v354_v28, %v44_v14 }
  0x93   : > { %v213_v32 = vmul.f32 %v212_v30, %v199_v29  ;;  %v230_v0 = vmul.f32 %v295_v27, %v229_v31 }
  0x95   : > { %v214_v11 = vadd.f32 %v387_v33, %v213_v32 }
  0x97   : > { %v232_v35 = vsel %vm231_vm8, %v214_v11, %v230_v0 }
  0x98   : > { %v233_v36 = vmax.f32 %v232_v35, 0.1  ;;  %169 = sbr.rel (!%p166_p6) target bundleno = 90 (0x5a), region = 60 }
  0x9a   : > { %v234_v33 = vmin.f32 %v233_v36, 36500.0  }
  0x9c   : > { %236 = vst [vmem:[%s563_s7] sm:$0xff] %v234_v33 }
  0x9d   :  { %245 = vsyncpa [#allocation5], 1 }

</bundles_post_ra>
